<compile_context>
chip_gen: v7x
topology: tpu7x:2x2x1
jax: 0.10.0
libtpu: 0.0.40
codegen_flags: <defaults>
</compile_context>

<pallas_src>
import jax
import jax.numpy as jnp
from jax.experimental import pallas as pl
from jax.experimental.pallas import tpu as pltpu


def _cdiv(a, b):
    return -(-a // b)


def _round_up(x, m):
    return _cdiv(x, m) * m


def _interp_matrix(out_size: int, in_size: int) -> jnp.ndarray:
    """Separable bilinear interpolation matrix, PyTorch align_corners=True."""
    if out_size == 1:
        coords = jnp.zeros((1,), jnp.float32)
    else:
        scale = (in_size - 1) / (out_size - 1)
        coords = jnp.arange(out_size, dtype=jnp.float32) * scale
    lo = jnp.clip(jnp.floor(coords).astype(jnp.int32), 0, in_size - 1)
    hi = jnp.minimum(lo + 1, in_size - 1)
    frac = coords - lo.astype(jnp.float32)
    rows = jnp.arange(out_size)
    w = jnp.zeros((out_size, in_size), jnp.float32)
    w = w.at[rows, lo].add(1.0 - frac)
    w = w.at[rows, hi].add(frac)
    return w


def _tpu_budgets():
    """Returns (working_set_budget_bytes, vmem_limit_bytes, tensorcores_per_chip)."""
    vmem_cap = 128 << 20
    cores = 1
    try:
        info = pltpu.get_tpu_info()
        vmem_cap = int(getattr(info, "vmem_capacity_bytes", vmem_cap) or vmem_cap)
        for name in ("num_cores", "tensorcore_count", "num_tensorcores", "cores_per_chip"):
            v = getattr(info, name, None)
            if v:
                cores = int(v)
                break
    except Exception:
        pass
    if cores == 1 and vmem_cap <= (64 << 20):
        cores = 2  # v7x-class part: 64 MiB VMEM per TC, 2 TensorCores per chip.
    working_budget = vmem_cap // 4               # double-buffered working-set target
    vmem_limit = min(64 << 20, vmem_cap // 2)    # 64 MiB on 128 MiB parts, 32 MiB on v7x
    return working_budget, int(vmem_limit), cores


def _balance_grid(nc, tc_req, sub, cores):
    """Pick planes-per-step (multiple of `sub`) and the padded plane count."""
    tc = max(sub, (tc_req // sub) * sub)
    tc = min(tc, _round_up(nc, sub))
    steps = _cdiv(nc, tc)
    if cores >= 2:
        # Give every TensorCore >= 2 steps so each core still gets DMA/compute
        # double-buffering under megacore sharding ("parallel" grid axis).
        target = 2 * cores
        if _cdiv(nc, sub) >= target:
            steps = max(steps, target)
    tc = _round_up(_cdiv(nc, steps), sub)
    return tc, steps * tc


def _scale_kron_kernel(x_ref, k_ref, o_ref):
    # x_ref: (TC, H_in*W_in)           lane-dense plane batch
    # k_ref: (H_in*W_in, H_out*W_out)  fused separable (Kronecker) weight
    # o_ref: (TC, H_out*W_out)         lane-dense output
    o_ref[...] = jnp.dot(x_ref[...], k_ref[...],
                         preferred_element_type=jnp.float32).astype(o_ref.dtype)


def _scale_separable_kernel(x_ref, wwt_ref, wh_ref, o_ref):
    # x_ref  : (TC*H_pad, W_in)  plane batch, H folded into the matmul M dim
    # wwt_ref: (W_in, W_out)     pre-transposed column-interp matrix
    # wh_ref : (H_out, H_pad)    row-interp matrix (zero-padded columns)
    # o_ref  : (TC, H_out, W_out)
    tc = o_ref.shape[0]
    h_pad = wh_ref.shape[1]

    # ---- W pass: one large-M MXU matmul over all folded plane rows. ----
    t = jnp.dot(x_ref[...], wwt_ref[...], preferred_element_type=jnp.float32)
    t = t.astype(wh_ref.dtype)   # 16-bit operands for bf16/f16 inputs, f32 otherwise

    # ---- H pass: weight-stationary per-plane matmuls (small static unroll). ----
    # Avoids materializing a TC-wide broadcast of Wh in VMEM.
    wh = wh_ref[...]
    for i in range(tc):
        ti = t[i * h_pad:(i + 1) * h_pad, :]          # sublane-aligned static slice
        o_ref[i] = jnp.dot(wh, ti,
                           preferred_element_type=jnp.float32).astype(o_ref.dtype)


def scale_forward(x: jnp.ndarray, out_shape) -> jnp.ndarray:
    """Equivalent of Scale((H_out, W_out)).forward(x) for 4D NCHW input."""
    assert x.ndim == 4, f"require 4D input; got {x.shape}"
    N, C, H_in, W_in = x.shape
    H_out, W_out = out_shape
    nc = N * C

    x_itemsize = int(jnp.dtype(x.dtype).itemsize)
    is_16bit = x_itemsize == 2
    w_dtype = x.dtype if is_16bit else jnp.float32
    w_itemsize = int(jnp.dtype(w_dtype).itemsize)
    sub = 16 if is_16bit else 8     # packed-sublane multiple for x's dtype
    lane = 128

    working_budget, vmem_limit, cores = _tpu_budgets()

    hw_in = H_in * W_in
    hw_out = H_out * W_out

    wh = _interp_matrix(H_out, H_in)     # (H_out, H_in) f32
    ww = _interp_matrix(W_out, W_in)     # (W_out, W_in) f32

    # ---------------- fused Kronecker path (small planes) ----------------
    kron_vmem = _round_up(hw_in, sub) * _round_up(hw_out, lane) * w_itemsize
    use_kron = kron_vmem <= (2 << 20)

    if use_kron:
        # K[h*W_in+w, o*W_out+p] = Wh[o,h] * Ww[p,w]
        kron = jnp.einsum("oh,pw->hwop", wh, ww).reshape(hw_in, hw_out).astype(w_dtype)

        per_plane = (2 * _round_up(hw_in, lane) * x_itemsize     # input  (double-buffered)
                     + 2 * _round_up(hw_out, lane) * x_itemsize  # output (double-buffered)
                     + _round_up(hw_out, lane) * 4)              # f32 matmul result
        fixed = 2 * kron_vmem                                    # resident weight
        tc_req = min(4096, max(sub, (working_budget - fixed) // max(per_plane, 1)))
        tc, padded_nc = _balance_grid(nc, tc_req, sub, cores)
        grid_steps = padded_nc // tc

        x2 = x.reshape(nc, hw_in)
        if padded_nc != nc:
            x2 = jnp.pad(x2, ((0, padded_nc - nc), (0, 0)))

        out2 = pl.pallas_call(
            _scale_kron_kernel,
            out_shape=jax.ShapeDtypeStruct((padded_nc, hw_out), x.dtype),
            grid=(grid_steps,),
            in_specs=[
                pl.BlockSpec((tc, hw_in), lambda g: (g, 0)),
                pl.BlockSpec((hw_in, hw_out), lambda g: (0, 0)),
            ],
            out_specs=pl.BlockSpec((tc, hw_out), lambda g: (g, 0)),
            compiler_params=pltpu.CompilerParams(
                dimension_semantics=("parallel",),
                vmem_limit_bytes=vmem_limit,
            ),
            cost_estimate=pl.CostEstimate(
                flops=2 * padded_nc * hw_in * hw_out,
                transcendentals=0,
                bytes_accessed=(padded_nc * (hw_in + hw_out) * x_itemsize
                                + hw_in * hw_out * w_itemsize),
            ),
        )(x2, kron)
        return out2[:nc].reshape(N, C, H_out, W_out)

    # ---------------- separable two-matmul path (larger planes) ----------------
    # Pad H_in to the packed-sublane multiple so (TC, H_pad, W_in) -> (TC*H_pad,
    # W_in) folding is layout-free and the W pass is always a single large-M
    # matmul (zero rows in x + zero columns in Wh: mathematically exact).
    h_pad = _round_up(H_in, sub)
    if h_pad != H_in:
        wh = jnp.pad(wh, ((0, 0), (0, h_pad - H_in)))
    wh = wh.astype(w_dtype)                  # f32, or bf16/f16 for 16-bit inputs
    wwt = ww.T.astype(w_dtype)               # (W_in, W_out), pre-transposed

    t_itemsize = 2 if is_16bit else 4
    per_plane = (2 * h_pad * _round_up(W_in, lane) * x_itemsize                   # input
                 + 2 * _round_up(H_out, sub) * _round_up(W_out, lane) * x_itemsize  # output
                 + h_pad * _round_up(W_out, lane) * (4 + t_itemsize)              # W-pass temps
                 + _round_up(H_out, 8) * _round_up(W_out, lane) * 4)              # H-pass temp
    fixed = 2 * (_round_up(W_in, 8) * _round_up(W_out, lane) * w_itemsize
                 + _round_up(H_out, 8) * _round_up(h_pad, lane) * w_itemsize)
    tc_req = max(1, min(8, (working_budget - fixed) // max(per_plane, 1)))
    tc, padded_nc = _balance_grid(nc, tc_req, 1, cores)
    grid_steps = padded_nc // tc

    xp = x.reshape(nc, H_in, W_in)
    if padded_nc != nc:
        xp = jnp.pad(xp, ((0, padded_nc - nc), (0, 0), (0, 0)))
    if h_pad != H_in:
        xp = jnp.pad(xp, ((0, 0), (0, h_pad - H_in), (0, 0)))
    x2 = xp.reshape(padded_nc * h_pad, W_in)

    out3 = pl.pallas_call(
        _scale_separable_kernel,
        out_shape=jax.ShapeDtypeStruct((padded_nc, H_out, W_out), x.dtype),
        grid=(grid_steps,),
        in_specs=[
            pl.BlockSpec((tc * h_pad, W_in), lambda g: (g, 0)),
            pl.BlockSpec((W_in, W_out), lambda g: (0, 0)),
            pl.BlockSpec((H_out, h_pad), lambda g: (0, 0)),
        ],
        out_specs=pl.BlockSpec((tc, H_out, W_out), lambda g: (g, 0, 0)),
        compiler_params=pltpu.CompilerParams(
            dimension_semantics=("parallel",),
            vmem_limit_bytes=vmem_limit,
        ),
        cost_estimate=pl.CostEstimate(
            flops=2 * padded_nc * (h_pad * W_in * W_out + H_out * h_pad * W_out),
            transcendentals=0,
            bytes_accessed=(padded_nc * (h_pad * W_in + H_out * W_out) * x_itemsize
                            + (W_in * W_out + H_out * h_pad) * w_itemsize),
        ),
    )(x2, wwt, wh)
    return out3[:nc].reshape(N, C, H_out, W_out)


def _reference_bilinear(x, out_shape):
    """Plain-JAX gather-based reference of bilinear align_corners=True (f32 math)."""
    N, C, H_in, W_in = x.shape
    H_out, W_out = out_shape

    def coords(out_size, in_size):
        if out_size == 1:
            c = jnp.zeros((1,), jnp.float32)
        else:
            c = jnp.arange(out_size, dtype=jnp.float32) * ((in_size - 1) / (out_size - 1))
        lo = jnp.clip(jnp.floor(c).astype(jnp.int32), 0, in_size - 1)
        hi = jnp.minimum(lo + 1, in_size - 1)
        f = c - lo.astype(jnp.float32)
        return lo, hi, f

    hlo, hhi, hf = coords(H_out, H_in)
    wlo, whi, wf = coords(W_out, W_in)
    xf = x.astype(jnp.float32)
    top = xf[:, :, hlo][:, :, :, wlo] * (1 - wf) + xf[:, :, hlo][:, :, :, whi] * wf
    bot = xf[:, :, hhi][:, :, :, wlo] * (1 - wf) + xf[:, :, hhi][:, :, :, whi] * wf
    return top * (1 - hf[:, None]) + bot * hf[:, None]


if __name__ == "__main__":
    key = jax.random.PRNGKey(0)

    # 1) Small-plane regime (the shapes this module targets): fused Kronecker
    #    path with lane-dense 2D input/output blocks.
    x = jax.random.normal(key, (2, 4, 16, 16), dtype=jnp.float32)
    out = jax.block_until_ready(scale_forward(x, (8, 8)))
    assert out.shape == (2, 4, 8, 8), out.shape
    ref = _reference_bilinear(x, (8, 8))
    assert jnp.allclose(out, ref, atol=1e-4, rtol=1e-4), "f32 mismatch vs reference"

    # 2) bf16 inputs: 16-bit MXU operands with f32 accumulation (loose tolerance).
    xb = x.astype(jnp.bfloat16)
    outb = jax.block_until_ready(scale_forward(xb, (8, 8)))
    assert outb.shape == (2, 4, 8, 8), outb.shape
    assert jnp.allclose(outb.astype(jnp.float32), ref, atol=1e-1, rtol=1e-1), \
        "bf16 mismatch vs reference"

    # 3) Larger planes take the separable two-matmul path (also exercises the
    #    dtype-aware H padding: 44 -> 48 rows).
    x2 = jax.random.normal(jax.random.PRNGKey(1), (1, 2, 44, 160), dtype=jnp.float32)
    out2 = jax.block_until_ready(scale_forward(x2, (96, 224)))
    assert out2.shape == (1, 2, 96, 224), out2.shape
    ref2 = _reference_bilinear(x2, (96, 224))
    assert jnp.allclose(out2, ref2, atol=1e-4, rtol=1e-4), "separable-path mismatch"

    print("KERNEL_OK")
</pallas_src>

<mosaic_0001>
module attributes {stable_mosaic.version = 11 : i64} {
  func.func @_scale_kron_kernel(%arg0: i32, %arg1: memref<8x256xf32, #tpu.memory_space<vmem>>, %arg2: memref<256x64xf32, #tpu.memory_space<vmem>>, %arg3: memref<8x64xf32, #tpu.memory_space<vmem>>) attributes {dimension_semantics = [#tpu.dimension_semantics<parallel>], iteration_bounds = array<i64: 1>, scalar_prefetch = 0 : i64, scratch_operands = 0 : i64, tpu.core_type = #tpu.core_type<tc>, window_params = [{transform_indices = @transform_0, window_bounds = array<i64: 8, 256>}, {pipeline_mode = #tpu.pipeline_mode<synchronous>, transform_indices = @transform_1, window_bounds = array<i64: 256, 64>}, {transform_indices = @transform_2, window_bounds = array<i64: 8, 64>}]} {
    %c0 = arith.constant 0 : index
    %c0_0 = arith.constant 0 : index
    %0 = vector.load %arg1[%c0, %c0_0] : memref<8x256xf32, #tpu.memory_space<vmem>>, vector<8x256xf32>
    %c0_1 = arith.constant 0 : index
    %c0_2 = arith.constant 0 : index
    %1 = vector.load %arg2[%c0_1, %c0_2] : memref<256x64xf32, #tpu.memory_space<vmem>>, vector<256x64xf32>
    %cst = arith.constant dense<0.000000e+00> : vector<8x64xf32>
    %2 = tpu.matmul %0, %1, %cst {dimension_numbers = #tpu.dot_dimension_numbers<[1], [0], [0], [1], [0, 0, 1, 1], [], []>} : vector<8x256xf32>, vector<256x64xf32>, vector<8x64xf32> -> vector<8x64xf32>
    %c0_3 = arith.constant 0 : index
    %c0_4 = arith.constant 0 : index
    %3 = vector.load %arg3[%c0_3, %c0_4] : memref<8x64xf32, #tpu.memory_space<vmem>>, vector<8x64xf32>
    tpu.vector_store %arg3[%c0_3, %c0_4], %2 {strides = array<i32>} : memref<8x64xf32, #tpu.memory_space<vmem>>, vector<8x64xf32>,
    return
  }
  func.func @transform_0(%arg0: i32) -> (i32, i32) {
    %c0_i32 = arith.constant 0 : i32
    %c0_i32_0 = arith.constant 0 : i32
    return %arg0, %c0_i32 : i32, i32
  }
  func.func @transform_1(%arg0: i32) -> (i32, i32) {
    %c0_i32 = arith.constant 0 : i32
    %c0_i32_0 = arith.constant 0 : i32
    %c0_i32_1 = arith.constant 0 : i32
    return %c0_i32, %c0_i32_0 : i32, i32
  }
  func.func @transform_2(%arg0: i32) -> (i32, i32) {
    %c0_i32 = arith.constant 0 : i32
    %c0_i32_0 = arith.constant 0 : i32
    return %arg0, %c0_i32 : i32, i32
  }
}

</mosaic_0001>

<bundles_post_ra>
// kernel: tpu_custom_call.1
= control target key start
LH: loop header
LB: loop body
LE: loop exit
PB: predicated region body
PF: predicated region fallthrough
CT: control target
= control target key end

     0   :  { %7 = vsyncpa [#allocation3], 0  ;;  %s367_s0 = inlined_call_operand.hbm [shape: f32[8,256], index: 0, kind: input, shape index: {}]   ;;  %s368_s1 = inlined_call_operand.hbm [shape: f32[256,64], index: 1, kind: input, shape index: {}]   ;;  %s369_s2 = inlined_call_operand.hbm [shape: f32[8,64], index: 2, kind: output, shape index: {}]  }
   0x1   :  { %8 = vsyncpa [#allocation6], 0 }
   0x2   :  { %9 = vsyncpa [#allocation4], 0  ;;  %s304_s9 = smov [#allocation2]   ;;  %s305_s11 = smov [#allocation5]  }
   0x3   :  { %s16_s10 = sshll.u32 %s304_s9, 4  ;;  %s25_s12 = sshll.u32 %s305_s11, 4  ;;  %s17_s10 = int_to_ptr.vmem [resolvable:$true] %s16_s10  ;;  %s324_s12 = int_to_ptr.vmem [resolvable:$true] %s25_s12 }
   0x4   :  { %s232_s15 = scalar_lea.hbm %s367_s0, 256 }
   0x5   :  { %p233_p0 = scmp.ne.s32.totalorder %s367_s0, %s232_s15  ;;  %p236_p1 = scmp.lt.u32.totalorder %s232_s15, %s367_s0 }
   0x7   :  { %p238_p2 = pnand %p236_p1, %p233_p0 }
   0x9   :  { %241 = shalt.err (!%p238_p2)
}
   0xa   :  { %s242_s20 = scalar_lea.vmem %s17_s10, 256  ;;  %p247_p4 = scmp.lt.s32.totalorder %s17_s10, %s17_s10 }
   0xb   :  { %p243_p3 = scmp.ne.s32.totalorder %s17_s10, %s242_s20  ;;  %p248_p5 = scmp.lt.s32.totalorder %s242_s20, %s242_s20 }
   0xd   :  { %p249_p6 = por %p248_p5, %p247_p4 }
   0xf   :  { %p250_p7 = pnand %p249_p6, %p243_p3 }
  0x11   :  { %253 = shalt.err (!%p250_p7)
}
  0x12   :  { %19 = dma.hbm_to_vmem [thread:$0]  %s367_s0, 256, %s17_s10, [#allocation3]  }
  0x13   :  { %s254_s25 = scalar_lea.hbm %s368_s1, 4096 }
  0x14   :  { %p255_p8 = scmp.ne.s32.totalorder %s368_s1, %s254_s25  ;;  %p258_p9 = scmp.lt.u32.totalorder %s254_s25, %s368_s1 }
  0x16   :  { %p260_p10 = pnand %p258_p9, %p255_p8 }
  0x18   :  { %263 = shalt.err (!%p260_p10)
}
  0x19   :  { %s264_s30 = scalar_lea.vmem %s324_s12, 4096  ;;  %p269_p12 = scmp.lt.s32.totalorder %s324_s12, %s324_s12 }
  0x1a   :  { %p265_p11 = scmp.ne.s32.totalorder %s324_s12, %s264_s30  ;;  %p270_p13 = scmp.lt.s32.totalorder %s264_s30, %s264_s30 }
  0x1c   :  { %p271_p0 = por %p270_p13, %p269_p12 }
  0x1e   :  { %p272_p1 = pnand %p271_p0, %p265_p11 }
  0x20   :  { %275 = shalt.err (!%p272_p1)
}
  0x21   :  { %s306_s0 = smov 128   ;;  %s307_s3 = smov 8  }
  0x22   :  { %31 = dma.hbm_to_vmem [thread:$0]  %s368_s1, 4096, %s324_s12, [#allocation6], %s306_s0, %s306_s0, %s307_s3  }
  0x23   :  { %298 = dma.done.wait [#allocation3], 256  }
  0x24   :  { %299 = vsyncadd [#allocation3], 4294967040 }
  0x25   :  { %300 = dma.done.wait [#allocation6], 4096  }
  0x26   :  { %301 = vsyncadd [#allocation6], 4294963200  ;;  %v56_v0 = vld [vmem:[#allocation5 + $0x80] sm:$0xff]  ;;  %v57_v1 = vld [vmem:[#allocation5 + $0x88] sm:$0xff]  ;;  %s308_s1 = smov [#allocation7]   ;;  %vm142_vm0 = vcmask 523264  }
  0x27   :  { %v40_v2 = vld [vmem:[#allocation5] sm:$0xff]  ;;  %v195_v3 = vpack.c.bf16 %v57_v1, %v56_v0  ;;  %v41_v4 = vld [vmem:[#allocation5 + $0x8] sm:$0xff]  ;;  %v58_v5 = vld [vmem:[#allocation5 + $0x90] sm:$0xff]  ;;  %s150_s6 = sshll.u32 %s308_s1, 4  ;;  %s151_s6 = int_to_ptr.vmem [resolvable:$true] %s150_s6 }
  0x28   :  { %v59_v6 = vld [vmem:[#allocation5 + $0x98] sm:$0xff]  ;;  %v197_v7 = vpack.c.bf16 %v41_v4, %v40_v2  ;;  %v42_v9 = vld [vmem:[#allocation5 + $0x10] sm:$0xff]  ;;  %v60_v11 = vld [vmem:[#allocation5 + $0xa0] sm:$0xff]  ;;  %s276_s7 = scalar_lea.vmem %s151_s6, 128  ;;  %p281_p3 = scmp.lt.s32.totalorder %s151_s6, %s151_s6 }
  0x29   :  { %v199_v8 = vpack.c.bf16 %v59_v6, %v58_v5  ;;  %v43_v10 = vld [vmem:[#allocation5 + $0x18] sm:$0xff]  ;;  %196 = vmatprep.subr.bf16.mxu0 %v195_v3  ;;  %v61_v12 = vld [vmem:[#allocation5 + $0xa8] sm:$0xff]  ;;  %v44_v15 = vld [vmem:[#allocation5 + $0x20] sm:$0xff]  ;;  %p277_p2 = scmp.ne.s32.totalorder %s151_s6, %s276_s7  ;;  %p282_p4 = scmp.lt.s32.totalorder %s276_s7, %s276_s7 }
  0x2a   :  { %198 = vmatpush3.bf16.msra.mxu0 %v197_v7  ;;  %v201_v13 = vpack.c.bf16 %v43_v10, %v42_v9  ;;  %v203_v14 = vpack.c.bf16 %v61_v12, %v60_v11  ;;  %v45_v16 = vld [vmem:[#allocation5 + $0x28] sm:$0xff]  ;;  %v62_v17 = vld [vmem:[#allocation5 + $0xb0] sm:$0xff]  ;;  %v63_v18 = vld [vmem:[#allocation5 + $0xb8] sm:$0xff] }
  0x2b   :  { %200 = vmatprep.subr.bf16.mxu0 %v199_v8  ;;  %v205_v19 = vpack.c.bf16 %v45_v16, %v44_v15  ;;  %v207_v20 = vpack.c.bf16 %v63_v18, %v62_v17  ;;  %v46_v21 = vld [vmem:[#allocation5 + $0x30] sm:$0xff]  ;;  %v47_v22 = vld [vmem:[#allocation5 + $0x38] sm:$0xff]  ;;  %v64_v23 = vld [vmem:[#allocation5 + $0xc0] sm:$0xff]  ;;  %p283_p5 = por %p282_p4, %p281_p3 }
  0x2c   :  { %v65_v24 = vld [vmem:[#allocation5 + $0xc8] sm:$0xff]  ;;  %v39_v25 = vld [vmem:[#allocation2 + $0x8] sm:$0xff]  ;;  %v209_v26 = vpack.c.bf16 %v47_v22, %v46_v21  ;;  %v48_v28 = vld [vmem:[#allocation5 + $0x40] sm:$0xff] }
  0x2d   :  { %136 = vmatprep.mubr.f32.mxu0 %v39_v25  ;;  %v211_v27 = vpack.c.bf16 %v65_v24, %v64_v23  ;;  %v49_v29 = vld [vmem:[#allocation5 + $0x48] sm:$0xff]  ;;  %v66_v30 = vld [vmem:[#allocation5 + $0xd0] sm:$0xff]  ;;  %v67_v31 = vld [vmem:[#allocation5 + $0xd8] sm:$0xff]  ;;  %p284_p6 = pnand %p283_p5, %p277_p2 }
  0x2e   :  { %202 = vmatpush3.bf16.msra.mxu0 %v201_v13  ;;  %v213_v32 = vpack.c.bf16 %v49_v29, %v48_v28  ;;  %v215_v33 = vpack.c.bf16 %v67_v31, %v66_v30  ;;  %v50_v34 = vld [vmem:[#allocation5 + $0x50] sm:$0xff]  ;;  %v51_v35 = vld [vmem:[#allocation5 + $0x58] sm:$0xff]  ;;  %v68_v36 = vld [vmem:[#allocation5 + $0xe0] sm:$0xff] }
  0x2f   :  { %204 = vmatprep.subr.bf16.mxu0 %v203_v14  ;;  %v69_v37 = vld [vmem:[#allocation5 + $0xe8] sm:$0xff]  ;;  %v217_v38 = vpack.c.bf16 %v51_v35, %v50_v34  ;;  %v52_v40 = vld [vmem:[#allocation5 + $0x60] sm:$0xff]  ;;  %v70_v42 = vld [vmem:[#allocation5 + $0xf0] sm:$0xff] }
  0x30   :  { %v219_v39 = vpack.c.bf16 %v69_v37, %v68_v36  ;;  %v53_v41 = vld [vmem:[#allocation5 + $0x68] sm:$0xff]  ;;  %v71_v43 = vld [vmem:[#allocation5 + $0xf8] sm:$0xff]  ;;  %v54_v46 = vld [vmem:[#allocation5 + $0x70] sm:$0xff] }
  0x31   :  { %v221_v44 = vpack.c.bf16 %v53_v41, %v52_v40  ;;  %v223_v45 = vpack.c.bf16 %v71_v43, %v70_v42  ;;  %v55_v47 = vld [vmem:[#allocation5 + $0x78] sm:$0xff]  ;;  %v38_v49 = vld [vmem:[#allocation2] sm:$0xff] }
  0x32   :  { %206 = vmatpush3.bf16.msra.mxu0 %v205_v19  ;;  %v225_v48 = vpack.c.bf16 %v55_v47, %v54_v46 }
  0x33   :  { %208 = vmatprep.subr.bf16.mxu0 %v207_v20 }
  0x36   :  { %210 = vmatpush3.bf16.msra.mxu0 %v209_v26 }
  0x37   :  { %212 = vmatprep.subr.bf16.mxu0 %v211_v27 }
  0x3a   :  { %214 = vmatpush3.bf16.msra.mxu0 %v213_v32 }
  0x3b   :  { %216 = vmatprep.subr.bf16.mxu0 %v215_v33 }
  0x3e   :  { %218 = vmatpush3.bf16.msra.mxu0 %v217_v38 }
  0x3f   :  { %220 = vmatprep.subr.bf16.mxu0 %v219_v39 }
  0x42   :  { %222 = vmatpush3.bf16.msra.mxu0 %v221_v44 }
  0x43   :  { %224 = vmatprep.subr.bf16.mxu0 %v223_v45 }
  0x46   :  { %226 = vmatpush3.bf16.msra.mxu0 %v225_v48 }
  0x49   :  { %137 = vmatmul.mubr.f32.vlgmr.msra.gmra.mrb[0].mxu0 %v38_v49 }
 0x11c   :  { %v192_v50 = vpop.f32.mrb[0].mxu0 }
 0x11d   :  { %v193_v51 = vpop.f32.mrb[1].mxu0 }
 0x11e   :  { %v194_v52 = vadd.f32 %v193_v51, %v192_v50 }
 0x120   :  { %143 = vst.msk [vmem:[#allocation7] sm:$0xff] %vm142_vm0, %v194_v52 }
 0x121   :  { %287 = shalt.err (!%p284_p6)
}
 0x122   :  { %s288_s10 = scalar_lea.hbm %s369_s2, 128 }
 0x123   :  { %p289_p7 = scmp.ne.s32.totalorder %s369_s2, %s288_s10  ;;  %p292_p8 = scmp.lt.u32.totalorder %s288_s10, %s369_s2 }
 0x125   :  { %p294_p9 = pnand %p292_p8, %p289_p7 }
 0x127   :  { %297 = shalt.err (!%p294_p9)
}
 0x128   :  { %153 = dma.vmem_to_hbm [thread:$0]  %s151_s6, 128, %s369_s2, [#allocation4]  }
 0x129   :  { %302 = dma.done.wait [#allocation4], 128  }
 0x12a   :  { %303 = vsyncadd [#allocation4], 4294967168 }
 0x12b   :  { %157 = vsyncpa [#allocation3], 1 }
 0x12c   :  { %158 = vsyncpa [#allocation6], 1 }
 0x12d   :  { %159 = vsyncpa [#allocation4], 1 }

</bundles_post_ra>
